<compile_context>
chip_gen: v7x
topology: tpu7x:2x2x1
jax: 0.10.0
libtpu: 0.0.40
codegen_flags: <defaults>
</compile_context>

<pallas_src>
import functools

import jax
import jax.numpy as jnp
from jax.experimental import pallas as pl
from jax.experimental.pallas import tpu as pltpu

_LANE = 128
_NEG = -1e30  # bias for padded logit columns -> exp underflows to 0


def actor_kernel(x_ref, w1_ref, b1_ref, w2_ref, b2_ref, out_ref):
    # (TB, I) bf16 @ (I, Hp) bf16 -> f32 accumulation on the MXU.
    h = jnp.dot(x_ref[...], w1_ref[...],
                preferred_element_type=jnp.float32) + b1_ref[...]
    h = jnp.maximum(h, 0.0)                                     # ReLU (VPU)
    logits = jnp.dot(h.astype(jnp.bfloat16), w2_ref[...],
                     preferred_element_type=jnp.float32) + b2_ref[...]
    # Numerically-stable softmax over axis=1 (matches nn.Softmax(dim=1)).
    # Padded columns carry a ~-1e30 bias, so they contribute 0 to max/sum.
    m = jnp.max(logits, axis=1, keepdims=True)
    e = jnp.exp(logits - m)
    denom = jnp.sum(e, axis=1, keepdims=True)
    out_ref[...] = (e * pl.reciprocal(denom, approx=True)).astype(out_ref.dtype)


def _round_up(n, m):
    return (n + m - 1) // m * m


@functools.partial(jax.jit, static_argnames=("block_b",))
def actor_forward(x, w1, b1, w2, b2, block_b=128):
    B, I = x.shape
    H = w1.shape[1]
    O = w2.shape[1]
    Hp = _round_up(H, _LANE)
    Op = _round_up(O, _LANE)
    Bp = _round_up(B, block_b)

    # Lane-dense padding (weights: once per call, negligible; x: batch pad only).
    x_p = jnp.pad(x, ((0, Bp - B), (0, 0))).astype(jnp.bfloat16)
    w1_p = jnp.pad(w1, ((0, 0), (0, Hp - H))).astype(jnp.bfloat16)
    b1_p = jnp.pad(b1.astype(jnp.float32), ((0, 0), (0, Hp - H)))
    w2_p = jnp.pad(w2, ((0, Hp - H), (0, Op - O))).astype(jnp.bfloat16)
    b2_p = jnp.pad(b2.astype(jnp.float32), ((0, 0), (0, Op - O)),
                   constant_values=_NEG)

    out = pl.pallas_call(
        actor_kernel,
        out_shape=jax.ShapeDtypeStruct((Bp, Op), jnp.float32),
        grid_spec=pltpu.PrefetchScalarGridSpec(
            num_scalar_prefetch=0,
            grid=(Bp // block_b,),
            in_specs=[
                pl.BlockSpec((block_b, I), lambda i: (i, 0)),   # x batch tile
                pl.BlockSpec((I, Hp), lambda i: (0, 0)),        # W1 (resident)
                pl.BlockSpec((1, Hp), lambda i: (0, 0)),        # b1 (resident)
                pl.BlockSpec((Hp, Op), lambda i: (0, 0)),       # W2 (resident)
                pl.BlockSpec((1, Op), lambda i: (0, 0)),        # b2 (resident)
            ],
            out_specs=pl.BlockSpec((block_b, Op), lambda i: (i, 0)),
        ),
        compiler_params=pltpu.CompilerParams(
            dimension_semantics=("parallel",),      # both TCs on v7x megacore
            vmem_limit_bytes=64 * 1024 * 1024,
        ),
    )(x_p, w1_p, b1_p, w2_p, b2_p)
    return out[:B, :O]


def init_params(key, i, h, o):
    # Deterministic synthetic init (PyTorch-style uniform fan-in bounds).
    k1, k2, k3, k4 = jax.random.split(key, 4)
    bound1 = 1.0 / (i ** 0.5)
    bound2 = 1.0 / (h ** 0.5)
    w1 = jax.random.uniform(k1, (i, h), jnp.float32, -bound1, bound1)
    b1 = jax.random.uniform(k2, (1, h), jnp.float32, -bound1, bound1)
    w2 = jax.random.uniform(k3, (h, o), jnp.float32, -bound2, bound2)
    b2 = jax.random.uniform(k4, (1, o), jnp.float32, -bound2, bound2)
    return w1, b1, w2, b2


if __name__ == "__main__":
    # ActorModel(i=32, o=16, h=64); a batch of 256 stacked policy evaluations
    # (two 128-row tiles -> exercises the batch grid and the parallel axis).
    B, I, H, O = 256, 32, 64, 16
    key = jax.random.PRNGKey(0)
    kx, kp = jax.random.split(key)
    x = jax.random.normal(kx, (B, I), jnp.float32)
    w1, b1, w2, b2 = init_params(kp, I, H, O)

    out = jax.block_until_ready(actor_forward(x, w1, b1, w2, b2))

    # f32 reference; tolerance covers bf16 matmul operands + approx reciprocal.
    h_ref = jnp.maximum(x @ w1 + b1, 0.0)
    ref = jax.nn.softmax(h_ref @ w2 + b2, axis=1)
    assert out.shape == (B, O)
    assert jnp.allclose(out, ref, atol=2e-2, rtol=2e-2)
    assert jnp.allclose(jnp.sum(out, axis=1), 1.0, atol=5e-3)

    print("KERNEL_OK")
</pallas_src>

<mosaic_0001>
module attributes {stable_mosaic.version = 11 : i64} {
  func.func @actor_kernel(%arg0: i32, %arg1: memref<128x32xbf16, #tpu.memory_space<vmem>>, %arg2: memref<32x128xbf16, #tpu.memory_space<vmem>>, %arg3: memref<1x128xf32, #tpu.memory_space<vmem>>, %arg4: memref<128x128xbf16, #tpu.memory_space<vmem>>, %arg5: memref<1x128xf32, #tpu.memory_space<vmem>>, %arg6: memref<128x128xf32, #tpu.memory_space<vmem>>) attributes {dimension_semantics = [#tpu.dimension_semantics<parallel>], iteration_bounds = array<i64: 2>, scalar_prefetch = 0 : i64, scratch_operands = 0 : i64, tpu.core_type = #tpu.core_type<tc>, window_params = [{transform_indices = @transform_0, window_bounds = array<i64: 128, 32>}, {pipeline_mode = #tpu.pipeline_mode<synchronous>, transform_indices = @transform_1, window_bounds = array<i64: 32, 128>}, {pipeline_mode = #tpu.pipeline_mode<synchronous>, transform_indices = @transform_2, window_bounds = array<i64: 1, 128>}, {pipeline_mode = #tpu.pipeline_mode<synchronous>, transform_indices = @transform_3, window_bounds = array<i64: 128, 128>}, {pipeline_mode = #tpu.pipeline_mode<synchronous>, transform_indices = @transform_4, window_bounds = array<i64: 1, 128>}, {transform_indices = @transform_5, window_bounds = array<i64: 128, 128>}]} {
    %c0 = arith.constant 0 : index
    %c0_0 = arith.constant 0 : index
    %0 = vector.load %arg1[%c0, %c0_0] : memref<128x32xbf16, #tpu.memory_space<vmem>>, vector<128x32xbf16>
    %c0_1 = arith.constant 0 : index
    %c0_2 = arith.constant 0 : index
    %1 = vector.load %arg2[%c0_1, %c0_2] : memref<32x128xbf16, #tpu.memory_space<vmem>>, vector<32x128xbf16>
    %cst = arith.constant dense<0.000000e+00> : vector<128x128xf32>
    %2 = tpu.matmul %0, %1, %cst {dimension_numbers = #tpu.dot_dimension_numbers<[1], [0], [0], [1], [0, 0, 1, 1], [], []>} : vector<128x32xbf16>, vector<32x128xbf16>, vector<128x128xf32> -> vector<128x128xf32>
    %c0_3 = arith.constant 0 : index
    %c0_4 = arith.constant 0 : index
    %3 = vector.load %arg3[%c0_3, %c0_4] : memref<1x128xf32, #tpu.memory_space<vmem>>, vector<1x128xf32>
    %4 = vector.broadcast %3 : vector<1x128xf32> to vector<128x128xf32>
    %5 = arith.addf %2, %4 : vector<128x128xf32>
    %cst_5 = arith.constant 0.000000e+00 : f32
    %6 = vector.broadcast %cst_5 : f32 to vector<128x128xf32>
    %7 = arith.maximumf %5, %6 : vector<128x128xf32>
    %8 = arith.truncf %7 : vector<128x128xf32> to vector<128x128xbf16>
    %c0_6 = arith.constant 0 : index
    %c0_7 = arith.constant 0 : index
    %9 = vector.load %arg4[%c0_6, %c0_7] : memref<128x128xbf16, #tpu.memory_space<vmem>>, vector<128x128xbf16>
    %cst_8 = arith.constant dense<0.000000e+00> : vector<128x128xf32>
    %10 = tpu.matmul %8, %9, %cst_8 {dimension_numbers = #tpu.dot_dimension_numbers<[1], [0], [0], [1], [0, 0, 1, 1], [], []>} : vector<128x128xbf16>, vector<128x128xbf16>, vector<128x128xf32> -> vector<128x128xf32>
    %c0_9 = arith.constant 0 : index
    %c0_10 = arith.constant 0 : index
    %11 = vector.load %arg5[%c0_9, %c0_10] : memref<1x128xf32, #tpu.memory_space<vmem>>, vector<1x128xf32>
    %12 = vector.broadcast %11 : vector<1x128xf32> to vector<128x128xf32>
    %13 = arith.addf %10, %12 : vector<128x128xf32>
    %cst_11 = arith.constant dense<0xFF800000> : vector<128xf32>
    %14 = vector.multi_reduction <maximumf>, %13, %cst_11 [1] : vector<128x128xf32> to vector<128xf32>
    %15 = vector.shape_cast %14 : vector<128xf32> to vector<128x1xf32>
    %16 = vector.broadcast %15 : vector<128x1xf32> to vector<128x128xf32>
    %17 = arith.subf %13, %16 : vector<128x128xf32>
    %18 = math.exp %17 : vector<128x128xf32>
    %cst_12 = arith.constant dense<0.000000e+00> : vector<128xf32>
    %19 = vector.multi_reduction <add>, %18, %cst_12 [1] : vector<128x128xf32> to vector<128xf32>
    %20 = vector.shape_cast %19 : vector<128xf32> to vector<128x1xf32>
    %21 = tpu.reciprocal %20 {approx = true} : vector<128x1xf32> -> vector<128x1xf32>
    %22 = vector.broadcast %21 : vector<128x1xf32> to vector<128x128xf32>
    %23 = arith.mulf %18, %22 : vector<128x128xf32>
    %c0_13 = arith.constant 0 : index
    %c0_14 = arith.constant 0 : index
    %24 = vector.load %arg6[%c0_13, %c0_14] : memref<128x128xf32, #tpu.memory_space<vmem>>, vector<128x128xf32>
    tpu.vector_store %arg6[%c0_13, %c0_14], %23 {strides = array<i32>} : memref<128x128xf32, #tpu.memory_space<vmem>>, vector<128x128xf32>,
    return
  }
  func.func @transform_0(%arg0: i32) -> (i32, i32) {
    %c0_i32 = arith.constant 0 : i32
    %c0_i32_0 = arith.constant 0 : i32
    return %arg0, %c0_i32 : i32, i32
  }
  func.func @transform_1(%arg0: i32) -> (i32, i32) {
    %c0_i32 = arith.constant 0 : i32
    %c0_i32_0 = arith.constant 0 : i32
    %c0_i32_1 = arith.constant 0 : i32
    return %c0_i32, %c0_i32_0 : i32, i32
  }
  func.func @transform_2(%arg0: i32) -> (i32, i32) {
    %c0_i32 = arith.constant 0 : i32
    %c0_i32_0 = arith.constant 0 : i32
    %c0_i32_1 = arith.constant 0 : i32
    return %c0_i32, %c0_i32_0 : i32, i32
  }
  func.func @transform_3(%arg0: i32) -> (i32, i32) {
    %c0_i32 = arith.constant 0 : i32
    %c0_i32_0 = arith.constant 0 : i32
    %c0_i32_1 = arith.constant 0 : i32
    return %c0_i32, %c0_i32_0 : i32, i32
  }
  func.func @transform_4(%arg0: i32) -> (i32, i32) {
    %c0_i32 = arith.constant 0 : i32
    %c0_i32_0 = arith.constant 0 : i32
    %c0_i32_1 = arith.constant 0 : i32
    return %c0_i32, %c0_i32_0 : i32, i32
  }
  func.func @transform_5(%arg0: i32) -> (i32, i32) {
    %c0_i32 = arith.constant 0 : i32
    %c0_i32_0 = arith.constant 0 : i32
    return %arg0, %c0_i32 : i32, i32
  }
}

</mosaic_0001>

<bundles_post_ra>
// kernel: actor_forward.1
= control target key start
LH: loop header
LB: loop body
LE: loop exit
PB: predicated region body
PF: predicated region fallthrough
CT: control target
= control target key end

     0   :  { %10 = vsyncpa [#allocation3], 0  ;;  %s1975_s0 = inlined_call_operand.hbm [shape: bf16[256,32], index: 0, kind: input, shape index: {}]   ;;  %s1976_s1 = inlined_call_operand.hbm [shape: bf16[32,128], index: 1, kind: input, shape index: {}]   ;;  %s1977_s2 = inlined_call_operand.hbm [shape: f32[1,128], index: 2, kind: input, shape index: {}]   ;;  %s1978_s3 = inlined_call_operand.hbm [shape: bf16[128,128], index: 3, kind: input, shape index: {}]   ;;  %s1979_s4 = inlined_call_operand.hbm [shape: f32[1,128], index: 4, kind: input, shape index: {}]   ;;  %s1980_s5 = inlined_call_operand.hbm [shape: f32[256,128], index: 5, kind: output, shape index: {}]  }
   0x1   :  { %12 = vsyncpa [#allocation3 + $0x1], 0 }
   0x2   :  { %13 = vsyncpa [#allocation6], 0 }
   0x3   :  { %14 = vsyncpa [#allocation9], 0 }
   0x4   :  { %15 = vsyncpa [#allocation4], 0 }
   0x5   :  { %17 = vsyncpa [#allocation4 + $0x1], 0  ;;  %s1555_s18 = smov 0   ;;  %s1557_s19 = smov 0  }
   0x6   :  { %s1559_s20 = smov 0   ;;  %s1561_s21 = smov 0  }
   0x7 LB: > { %s1576_s22 = sadd.s32 4294967295, %s1513_s21   ;;  %s978_s23 = sadd.s32 4294967294, %s1513_s21   ;;  %s1513_s21 = sphi %s1561_s21, %s2003_s21   ;;  %s1509_s20 = sphi %s1559_s20, %s2002_s20   ;;  %s1505_s19 = sphi %s1557_s19, %s2001_s19   ;;  %s1501_s18 = sphi %s1555_s18, %s2000_s18  }
   0x8   : > { %p43_p0 = scmp.ne.s32.totalorder %s1505_s19, %s1501_s18  ;;  %p1981_p1 = scmp.eq.s32.totalorder %s1576_s22, 0 }
   0x9   : > { %p157_p3 = scmp.eq.s32.totalorder %s978_s23, 1  ;;  %p979_p5 = scmp.ge.s32.totalorder %s1513_s21, 1 }
   0xa   : > { %p1585_p4 = por %p1981_p1, %p43_p0  ;;  %p164_p7 = scmp.lt.s32.totalorder %s1513_s21, 3 }
   0xb   : > { %p1590_p6 = por %p157_p3, %p43_p0  ;;  %s1515_s27 = smov [#allocation5]  }
   0xc   : > { %s1984_s24 = scalar_select %p1585_p4, 1, 0 }
   0xd   : > { %s1985_s25 = scalar_select %p1590_p6, 1, 0 }
   0xe   : > { %p1595_p8 = pnand %p979_p5, %p164_p7  ;;  %s176_s28 = sshll.u32 %s1515_s27, 4  ;;  %s1599_s28 = int_to_ptr.vmem [resolvable:$true] %s176_s28 }
   0xf   : > { %s1516_s30 = smov [#allocation8]   ;;  %s1517_s7 = smov [#allocation7]  }
  0x10   : > { %s1986_s26 = scalar_select %p1595_p8, 1, 0 }
  0x11   : > { %p1144_p9 = pneg %p1595_p8  ;;  %s200_s6 = sshll.u32 %s1516_s30, 4  ;;  %s1610_s6 = int_to_ptr.vmem [resolvable:$true] %s200_s6 }
  0x12   : > { %s1612_s8 = sshll.u32 %s1517_s7, 4  ;;  %s1297_s11 = scalar_lea.hbm %s1976_s1, 256  ;;  %s191_s8 = int_to_ptr.vmem [resolvable:$true] %s1612_s8 }
  0x13   : > { %p1606_p11 = pnand %p1144_p9, %p1981_p1  ;;  %p1298_p12 = scmp.ne.s32.totalorder %s1976_s1, %s1297_s11 }
  0x14   : > { %p1304_p5 = scmp.lt.u32.totalorder %s1297_s11, %s1976_s1 }
  0x15   : > { %p1622_p13 = pneg %p1606_p11 }
  0x17   : > { %p1300_p0 = pnand %p1622_p13, %p1298_p12 }
  0x19   : > { %p1301_p3 = pneg %p1300_p0 }
  0x1b   : > { %p1306_p7 = pnand %p1304_p5, %p1301_p3 }
  0x1d   : > { %1309 = shalt.err (!%p1306_p7)
}
  0x1e   : > { %s1310_s17 = scalar_lea.vmem %s1599_s28, 256  ;;  %p1318_p2 = scmp.lt.s32.totalorder %s1599_s28, %s1599_s28 }
  0x1f   : > { %p1311_p9 = scmp.ne.s32.totalorder %s1599_s28, %s1310_s17  ;;  %p1319_p6 = scmp.lt.s32.totalorder %s1310_s17, %s1310_s17 }
  0x21   : > { %p1313_p10 = pnand %p1311_p9, %p1622_p13  ;;  %p1320_p12 = por %p1319_p6, %p1318_p2 }
  0x23   : > { %p1314_p1 = pneg %p1313_p10 }
  0x25   : > { %p1321_p0 = pnand %p1320_p12, %p1314_p1 }
  0x27   : > { %1324 = shalt.err (!%p1321_p0)
}
  0x28   : > { %s1518_s23 = smov 64   ;;  %s1519_s27 = smov 4  }
  0x29   : > { %1147 = dma.hbm_to_vmem [thread:$0]  (!%p1606_p11), %s1976_s1, 256, %s1599_s28, [#allocation6], %s1518_s23, %s1518_s23, %s1519_s27  }
  0x2a   : > { %s1325_s11 = scalar_lea.hbm %s1978_s3, 1024 }
  0x2b   : > { %p1326_p1 = scmp.ne.s32.totalorder %s1978_s3, %s1325_s11  ;;  %p1332_p10 = scmp.lt.u32.totalorder %s1325_s11, %s1978_s3 }
  0x2d   : > { %p1328_p2 = pnand %p1326_p1, %p1622_p13 }
  0x2f   : > { %p1329_p6 = pneg %p1328_p2 }
  0x31   : > { %p1334_p3 = pnand %p1332_p10, %p1329_p6 }
  0x33   : > { %1337 = shalt.err (!%p1334_p3)
}
  0x34   : > { %s1338_s28 = scalar_lea.vmem %s1610_s6, 1024  ;;  %p1346_p12 = scmp.lt.s32.totalorder %s1610_s6, %s1610_s6 }
  0x35   : > { %p1339_p5 = scmp.ne.s32.totalorder %s1610_s6, %s1338_s28  ;;  %p1347_p0 = scmp.lt.s32.totalorder %s1338_s28, %s1338_s28 }
  0x37   : > { %p1341_p7 = pnand %p1339_p5, %p1622_p13  ;;  %p1348_p1 = por %p1347_p0, %p1346_p12 }
  0x39   : > { %p1342_p9 = pneg %p1341_p7 }
  0x3b   : > { %p1349_p2 = pnand %p1348_p1, %p1342_p9 }
  0x3d   : > { %1352 = shalt.err (!%p1349_p2)
}
  0x3e   : > { %1153 = dma.hbm_to_vmem [thread:$0]  (!%p1606_p11), %s1978_s3, 1024, %s1610_s6, [#allocation9], %s1518_s23, %s1518_s23, %s1519_s27  }
  0x3f   : > { %s1353_s10 = scalar_lea.hbm %s1977_s2, 16 }
  0x40   : > { %p1354_p6 = scmp.ne.s32.totalorder %s1977_s2, %s1353_s10  ;;  %p1360_p5 = scmp.lt.u32.totalorder %s1353_s10, %s1977_s2 }
  0x42   : > { %p1356_p10 = pnand %p1354_p6, %p1622_p13 }
  0x44   : > { %p1357_p3 = pneg %p1356_p10 }
  0x46   : > { %p1362_p7 = pnand %p1360_p5, %p1357_p3 }
  0x48   : > { %1365 = shalt.err (!%p1362_p7)
}
  0x49   : > { %s1366_s16 = scalar_lea.vmem %s191_s8, 16  ;;  %s1373_s6 = scalar_lea.vmem %s191_s8, 32 }
  0x4a   : > { %p1367_p9 = scmp.ne.s32.totalorder %s191_s8, %s1366_s16  ;;  %p1374_p1 = scmp.lt.s32.totalorder %s191_s8, %s191_s8 }
  0x4b   : > { %p1375_p2 = scmp.lt.s32.totalorder %s1373_s6, %s1366_s16 }
  0x4c   : > { %p1369_p12 = pnand %p1367_p9, %p1622_p13 }
  0x4d   : > { %p1376_p4 = por %p1375_p2, %p1374_p1 }
  0x4e   : > { %p1370_p0 = pneg %p1369_p12 }
  0x50   : > { %p1377_p8 = pnand %p1376_p4, %p1370_p0 }
  0x52   : > { %1380 = shalt.err (!%p1377_p8)
}
  0x53   : > { %1150 = dma.hbm_to_vmem [thread:$0]  (!%p1606_p11), %s1977_s2, 16, %s191_s8, [#allocation6]  }
  0x54   : > { %s1520_s30 = smov [#allocation10]   ;;  %s1381_s11 = scalar_lea.hbm %s1979_s4, 16 }
  0x55   : > { %s214_s7 = sshll.u32 %s1520_s30, 4  ;;  %p1382_p6 = scmp.ne.s32.totalorder %s1979_s4, %s1381_s11  ;;  %s215_s7 = int_to_ptr.vmem [resolvable:$true] %s214_s7 }
  0x56   : > { %p1388_p10 = scmp.lt.u32.totalorder %s1381_s11, %s1979_s4 }
  0x57   : > { %p1384_p4 = pnand %p1382_p6, %p1622_p13 }
  0x59   : > { %p1385_p8 = pneg %p1384_p4 }
  0x5b   : > { %p1390_p3 = pnand %p1388_p10, %p1385_p8 }
  0x5d   : > { %1393 = shalt.err (!%p1390_p3)
}
  0x5e   : > { %s1394_s8 = scalar_lea.vmem %s215_s7, 16  ;;  %s1401_s6 = scalar_lea.vmem %s215_s7, 32 }
  0x5f   : > { %p1395_p5 = scmp.ne.s32.totalorder %s215_s7, %s1394_s8  ;;  %p1402_p12 = scmp.lt.s32.totalorder %s215_s7, %s215_s7 }
  0x60   : > { %p1403_p0 = scmp.lt.s32.totalorder %s1401_s6, %s1394_s8 }
  0x61   : > { %p1397_p7 = pnand %p1395_p5, %p1622_p13 }
  0x62   : > { %p1404_p1 = por %p1403_p0, %p1402_p12 }
  0x63   : > { %p1398_p9 = pneg %p1397_p7 }
  0x65   : > { %p1405_p2 = pnand %p1404_p1, %p1398_p9 }
  0x67   : > { %1408 = shalt.err (!%p1405_p2)
}
  0x68   : > { %1156 = dma.hbm_to_vmem [thread:$0]  (!%p1606_p11), %s1979_s4, 16, %s215_s7, [#allocation9]  }
  0x69   : > { %s1710_s14 = sadd.s32 1, %s1513_s21   ;;  %s30_s30 = sadd.s32 1, %s1509_s20 }
  0x6a   : > { %s27_s29 = ssub.s32 %s1513_s21, %s1710_s14  ;;  %p37_p13 = scmp.ne.s32.totalorder %s1509_s20, %s1505_s19 }
  0x6b   : > { %p28_p6 = scmp.eq.s32.totalorder %s27_s29, 0  ;;  %p38_p4 = scmp.eq.s32.totalorder %s1513_s21, 0 }
  0x6c   : > { %p1989_p8 = scmp.eq.s32.totalorder %s1576_s22, 1  ;;  %p1169_p3 = scmp.lt.s32.totalorder %s1513_s21, 2 }
  0x6d   : > { %s1726_s10 = scalar_select %p28_p6, %s1509_s20, %s30_s30  }
  0x6e   : > { %p1720_p10 = por %p1989_p8, %p37_p13  ;;  %p39_p5 = por %p38_p4, %p37_p13 }
  0x6f   : > { %s225_s11 = sand.u32 1, %s1509_s20   ;;  %s1028_s7 = sshll.u32 %s1513_s21, 10 }
  0x70   : > { %s985_s12 = sshll.u32 %s225_s11, 6  ;;  %s1733_s16 = scalar_lea.hbm %s1975_s0, %s1028_s7 }
  0x71   : > { %s229_s8 = scalar_lea.vmem [#allocation2], %s985_s12  ;;  %p1737_p11 = pnand %p1169_p3, %p39_p5 }
  0x72   : > { %s236_s6 = sshll.u32 %s229_s8, 4  ;;  %s1741_s17 = scalar_lea.sflag [#allocation3], %s225_s11  ;;  %s1735_s6 = int_to_ptr.vmem [resolvable:$true] %s236_s6 }
  0x73   : > { %s1409_s30 = scalar_lea.hbm %s1733_s16, 1024  ;;  %p1411_p9 = pneg %p1737_p11 }
  0x74   : > { %p1410_p7 = scmp.ne.s32.totalorder %s1733_s16, %s1409_s30  ;;  %s1414_s7 = scalar_lea.hbm %s1975_s0, 2048 }
  0x75   : > { %p1415_p1 = scmp.lt.u32.totalorder %s1733_s16, %s1975_s0  ;;  %p1416_p2 = scmp.lt.u32.totalorder %s1414_s7, %s1409_s30 }
  0x76   : > { %p1412_p12 = pnand %p1411_p9, %p1410_p7  ;;  %p1418_p6 = scmp.lt.u32.totalorder %s1409_s30, %s1733_s16 }
  0x77   : > { %p1417_p13 = por %p1416_p2, %p1415_p1 }
  0x78   : > { %p1413_p0 = pneg %p1412_p12 }
  0x79   : > { %p1419_p4 = por %p1418_p6, %p1417_p13 }
  0x7b   : > { %p1420_p8 = pnand %p1419_p4, %p1413_p0 }
  0x7d   : > { %1423 = shalt.err (!%p1420_p8)
}
  0x7e   : > { %s1424_s11 = scalar_lea.vmem %s1735_s6, 1024  ;;  %s1521_s8 = smov [#allocation2]  }
  0x7f   : > { %p1425_p3 = scmp.ne.s32.totalorder %s1735_s6, %s1424_s11  ;;  %s1429_s29 = sshll.u32 %s1521_s8, 4  ;;  %s1430_s29 = int_to_ptr.vmem [resolvable:$false] %s1429_s29 }
  0x80   : > { %s1431_s12 = scalar_lea.vmem %s1430_s29, 2048  ;;  %p1432_p12 = scmp.lt.s32.totalorder %s1735_s6, %s1430_s29 }
  0x81   : > { %p1427_p5 = pnand %p1425_p3, %p1411_p9  ;;  %p1433_p1 = scmp.lt.s32.totalorder %s1431_s12, %s1424_s11 }
  0x83   : > { %p1428_p7 = pneg %p1427_p5  ;;  %p1434_p2 = por %p1433_p1, %p1432_p12 }
  0x85   : > { %p1435_p13 = pnand %p1434_p2, %p1428_p7 }
  0x87   : > { %1438 = shalt.err (!%p1435_p13)
}
  0x88   : > { %1160 = dma.hbm_to_vmem [thread:$0]  (!%p1737_p11), %s1733_s16, 1024, %s1735_s6, %s1741_s17, %s1518_s23, %s1518_s23, %s1519_s27  }
  0x89   : > { %p1992_p9 = scmp.ne.s32.totalorder %s1986_s26, 0 }
  0x8a   : > { %s1775_s30 = sand.u32 (!%p1992_p9), 1, %s1505_s19   ;;  %p1993_p0 = scmp.ne.s32.totalorder (!%p1992_p9), %s1984_s24, 0 }
  0x8b   : > { %248 = sbr.rel (%p1992_p9) target bundleno = 958 (0x3be), region = 40  ;;  %s989_s7 = sshll.u32 (!%p1992_p9), %s1775_s30, 6 }
  0x8c   : > { %s251_s13 = scalar_lea.sflag (!%p1992_p9), [#allocation3], %s1775_s30  ;;  %s1779_s15 = scalar_lea.vmem (!%p1992_p9), [#allocation2], %s989_s7 }
  0x92   : > { %1484 = dma.done.wait (%p1993_p0), %s251_s13, 1024  }
  0x93   : > { %1486 = vsyncadd (%p1993_p0), %s251_s13, 4294966272  ;;  %p1994_p11 = scmp.eq.s32.totalorder %s1576_s22, 0 }
  0x95   : > { %1488 = dma.done.wait (%p1994_p11), [#allocation6], 272   ;;  %p1995_p6 = pmov %p1994_p11 }
  0x97   : > { %1490 = vsyncadd (%p1995_p6), [#allocation6], 4294967024  ;;  %p1996_p4 = pmov %p1995_p6 }
  0x99   : > { %1492 = dma.done.wait (%p1996_p4), [#allocation9], 1040   ;;  %p1997_p8 = pmov %p1996_p4 }
  0x9a   : > { %v1215_v0 = vld [vmem:[#allocation5] sm:$0xff]   ;;  %v1216_v1 = vld [vmem:[#allocation5 + $0x8] sm:$0xff]   ;;  %vm379_vm0 = vcmask 261120   ;;  %v1219_v4 = vld [vmem:[%s1779_s15 + $0x10] sm:$0xff]   ;;  %s994_s24 = sshll.u32 %s1775_s30, 7  ;;  %s1029_s23 = sshll.u32 %s1576_s22, 11 }
  0x9b   : > { %1494 = vsyncadd (%p1997_p8), [#allocation9], 4294966256  ;;  %1056 = vmatprep.subr.bf16.mxu0 %v1215_v0  ;;  %v1217_v2 = vld [vmem:[%s1779_s15] sm:$0xff]   ;;  %v1218_v3 = vld [vmem:[%s1779_s15 + $0x8] sm:$0xff]   ;;  %s1891_s26 = scalar_lea.vmem [#allocation11], %s994_s24  ;;  %s1927_s28 = scalar_lea.hbm %s1980_s5, %s1029_s23 }
  0x9c   : > { %1057 = vmatpush3.bf16.msra.mxu0 %v1215_v0  ;;  %1060 = vmatprep.mubr.msk.bf16.mxu0 %vm379_vm0, %v1217_v2  ;;  %v1225_v5 = vld [vmem:[#allocation8] sm:$0xff]   ;;  %v1226_v6 = vld [vmem:[#allocation8 + $0x8] sm:$0xff]   ;;  %v1227_v8 = vld [vmem:[#allocation8 + $0x10] sm:$0xff]   ;;  %s867_s27 = sshll.u32 %s1891_s26, 4  ;;  %s854_s22 = scalar_lea.sflag [#allocation4], %s1775_s30  ;;  %s1929_s27 = int_to_ptr.vmem [resolvable:$true] %s867_s27 }
  0x9d   : > { %1058 = vmatprep.subr.bf16.mxu0 %v1216_v1  ;;  %1108 = vmatprep.subr.bf16.mxu1 %v1225_v5  ;;  %v1220_v7 = vld [vmem:[%s1779_s15 + $0x18] sm:$0xff]   ;;  %v1221_v9 = vld [vmem:[%s1779_s15 + $0x20] sm:$0xff]   ;;  %v1228_v10 = vld [vmem:[#allocation8 + $0x18] sm:$0xff]   ;;  %s1439_s17 = scalar_lea.vmem %s1929_s27, 2048  ;;  %s1522_s11 = smov [#allocation11]  }
  0x9e   : > { %1116 = vmatpush3.bf16.msra.mxu1 %v1225_v5  ;;  %v1222_v11 = vld [vmem:[%s1779_s15 + $0x28] sm:$0xff]   ;;  %v1229_v12 = vld [vmem:[#allocation8 + $0x20] sm:$0xff]   ;;  %v1230_v14 = vld [vmem:[#allocation8 + $0x28] sm:$0xff]   ;;  %p1440_p3 = scmp.ne.s32.totalorder %s1929_s27, %s1439_s17  ;;  %s1443_s8 = sshll.u32 %s1522_s11, 4  ;;  %s1444_s8 = int_to_ptr.vmem [resolvable:$false] %s1443_s8 }
  0x9f   : > { %1109 = vmatprep.subr.bf16.mxu1 %v1226_v6  ;;  %v1223_v13 = vld [vmem:[%s1779_s15 + $0x30] sm:$0xff]   ;;  %v1224_v15 = vld [vmem:[%s1779_s15 + $0x38] sm:$0xff]   ;;  %v1231_v16 = vld [vmem:[#allocation8 + $0x30] sm:$0xff]   ;;  %s1445_s29 = scalar_lea.vmem %s1444_s8, 4096  ;;  %p1446_p12 = scmp.lt.s32.totalorder %s1929_s27, %s1444_s8 }
  0xa0   : > { %1059 = vmatpush3.bf16.msra.mxu0 %v1216_v1  ;;  %v1232_v17 = vld [vmem:[#allocation8 + $0x38] sm:$0xff]   ;;  %p1441_p5 = pnand %p1440_p3, %p1720_p10  ;;  %p1447_p1 = scmp.lt.s32.totalorder %s1445_s29, %s1439_s17 }
  0xa1   : > { %1076 = vmatprep.subr.bf16.mxu0 %v1225_v5  ;;  %v995_v18 = vld [vmem:[#allocation7] ss:$0 sm:$0xff] }
  0xa2   : > { %1117 = vmatpush3.bf16.msra.mxu1 %v1226_v6  ;;  %p1442_p7 = pneg %p1441_p5  ;;  %p1448_p2 = por %p1447_p1, %p1446_p12 }
  0xa3   : > { %1061 = vmatmul.mubr.msk.bf16.vlgmr.msra.gmra.mrb[0].mxu0 %vm379_vm0, %v1218_v3  ;;  %1110 = vmatprep.subr.bf16.mxu1 %v1227_v8 }
  0xa4   : > { %1064 = vmatprep.mubr.msk.bf16.mxu0 %vm379_vm0, %v1219_v4  ;;  %1077 = vmatpush3.bf16.msra.mxu0 %v1225_v5  ;;  %p1449_p13 = pnand %p1448_p2, %p1442_p7 }
  0xa5   : > { %1078 = vmatprep.subr.bf16.mxu0 %v1226_v6 }
  0xa6   : > { %1118 = vmatpush3.bf16.msra.mxu1 %v1227_v8 }
  0xa7   : > { %1111 = vmatprep.subr.bf16.mxu1 %v1228_v10 }
  0xa8   : > { %1079 = vmatpush3.bf16.msra.mxu0 %v1226_v6 }
  0xa9   : > { %1080 = vmatprep.subr.bf16.mxu0 %v1227_v8 }
  0xaa   : > { %1119 = vmatpush3.bf16.msra.mxu1 %v1228_v10 }
  0xab   : > { %1065 = vmatmul.mubr.msk.bf16.gmra.mrb[4].mxu0 %vm379_vm0, %v1220_v7  ;;  %1112 = vmatprep.subr.bf16.mxu1 %v1229_v12 }
  0xac   : > { %1068 = vmatprep.mubr.msk.bf16.mxu0 %vm379_vm0, %v1221_v9  ;;  %1081 = vmatpush3.bf16.msra.mxu0 %v1227_v8 }
  0xad   : > { %1082 = vmatprep.subr.bf16.mxu0 %v1228_v10 }
  0xae   : > { %1120 = vmatpush3.bf16.msra.mxu1 %v1229_v12 }
  0xaf   : > { %1113 = vmatprep.subr.bf16.mxu1 %v1230_v14 }
  0xb0   : > { %1083 = vmatpush3.bf16.msra.mxu0 %v1228_v10 }
  0xb1   : > { %1084 = vmatprep.subr.bf16.mxu0 %v1229_v12 }
  0xb2   : > { %1121 = vmatpush3.bf16.msra.mxu1 %v1230_v14 }
  0xb3   : > { %1069 = vmatmul.mubr.msk.bf16.gmra.mrb[8].mxu0 %vm379_vm0, %v1222_v11  ;;  %1114 = vmatprep.subr.bf16.mxu1 %v1231_v16  ;;  %v1014_v11 = vld [vmem:[#allocation10] ss:$0 sm:$0xff] }
  0xb4   : > { %1072 = vmatprep.mubr.msk.bf16.mxu0 %vm379_vm0, %v1223_v13  ;;  %1085 = vmatpush3.bf16.msra.mxu0 %v1229_v12 }
  0xb5   : > { %1086 = vmatprep.subr.bf16.mxu0 %v1230_v14 }
  0xb6   : > { %1122 = vmatpush3.bf16.msra.mxu1 %v1231_v16 }
  0xb7   : > { %1115 = vmatprep.subr.bf16.mxu1 %v1232_v17 }
  0xb8   : > { %1087 = vmatpush3.bf16.msra.mxu0 %v1230_v14 }
  0xb9   : > { %1088 = vmatprep.subr.bf16.mxu0 %v1231_v16 }
  0xba   : > { %1123 = vmatpush3.bf16.msra.mxu1 %v1232_v17 }
  0xbb   : > { %1073 = vmatmul.mubr.msk.bf16.gmra.mrb[12].mxu0 %vm379_vm0, %v1224_v15 }
  0xbc   : > { %1089 = vmatpush3.bf16.msra.mxu0 %v1231_v16 }
  0xbd   : > { %1090 = vmatprep.subr.bf16.mxu0 %v1232_v17 }
  0xc0   : > { %1091 = vmatpush3.bf16.msra.mxu0 %v1232_v17 }
 0x176   : > { %v1062_v19 = vpop.f32.mrb[0].mxu0 }
 0x177   : > { %v447_v20 = vadd.f32 %v1062_v19, %v995_v18  ;;  %v438_v21 = vpop.f32.mrb[1].mxu0 }
 0x178   : > { %v439_v22 = vadd.f32 %v995_v18, %v438_v21  ;;  %v1063_v23 = vpop.f32.mrb[2].mxu0 }
 0x179   : > { %v450_v24 = vadd.f32 %v1063_v23, %v995_v18  ;;  %v441_v25 = vpop.f32.mrb[3].mxu0  ;;  %v503_v27 = vmax.f32 %v447_v20, 0.0 }
 0x17a   : > { %v442_v26 = vadd.f32 %v995_v18, %v441_v25  ;;  %v501_v29 = vmax.f32 %v439_v22, 0.0 }
 0x17b   : > { %v504_v28 = vmax.f32 %v450_v24, 0.0 }
 0x17c   : > { %v502_v30 = vmax.f32 %v442_v26, 0.0 }
 0x17d   : > { %v518_v31 = vpack.c.bf16 %v504_v28, %v503_v27 }
 0x17e   : > { %v517_v32 = vpack.c.bf16 %v502_v30, %v501_v29  ;;  %v1066_v33 = vpop.f32.mrb[4].mxu0 }
 0x17f   : > { %v463_v34 = vadd.f32 %v1066_v33, %v995_v18  ;;  %v454_v35 = vpop.f32.mrb[5].mxu0 }
 0x180   : > { %v455_v36 = vadd.f32 %v995_v18, %v454_v35  ;;  %v1067_v37 = vpop.f32.mrb[6].mxu0  ;;  %1092 = vmatprep.mubr.bf16.mxu0 %v517_v32 }
 0x181   : > { %v507_v38 = vmax.f32 %v463_v34, 0.0  ;;  %v466_v39 = vadd.f32 %v1067_v37, %v995_v18  ;;  %v457_v40 = vpop.f32.mrb[7].mxu0  ;;  %1093 = vmatmul.mubr.bf16.vlgmr.msra.gmra.mrb[16].mxu0 %v518_v31 }
 0x182   : > { %v458_v41 = vadd.f32 %v995_v18, %v457_v40  ;;  %v505_v43 = vmax.f32 %v455_v36, 0.0 }
 0x183   : > { %v508_v42 = vmax.f32 %v466_v39, 0.0 }
 0x184   : > { %v506_v44 = vmax.f32 %v458_v41, 0.0 }
 0x185   : > { %v520_v45 = vpack.c.bf16 %v508_v42, %v507_v38 }
 0x186   : > { %v1070_v46 = vpop.f32.mrb[8].mxu0  ;;  %v519_v47 = vpack.c.bf16 %v506_v44, %v505_v43 }
 0x187   : > { %v479_v48 = vadd.f32 %v1070_v46, %v995_v18  ;;  %v470_v49 = vpop.f32.mrb[9].mxu0 }
 0x188   : > { %v471_v50 = vadd.f32 %v995_v18, %v470_v49  ;;  %v1071_v51 = vpop.f32.mrb[10].mxu0  ;;  %1096 = vmatprep.mubr.bf16.mxu1 %v519_v47 }
 0x189   : > { %v511_v52 = vmax.f32 %v479_v48, 0.0  ;;  %v482_v53 = vadd.f32 %v1071_v51, %v995_v18  ;;  %v473_v54 = vpop.f32.mrb[11].mxu0  ;;  %1097 = vmatmul.mubr.bf16.vlgmr.msra.gmra.mrb[0].mxu1 %v520_v45 }
 0x18a   : > { %v474_v55 = vadd.f32 %v995_v18, %v473_v54  ;;  %v509_v57 = vmax.f32 %v471_v50, 0.0 }
 0x18b   : > { %v512_v56 = vmax.f32 %v482_v53, 0.0 }
 0x18c   : > { %v510_v58 = vmax.f32 %v474_v55, 0.0 }
 0x18d   : > { %v522_v59 = vpack.c.bf16 %v512_v56, %v511_v52 }
 0x18e   : > { %v521_v60 = vpack.c.bf16 %v510_v58, %v509_v57  ;;  %v1074_v61 = vpop.f32.mrb[12].mxu0 }
 0x18f   : > { %v495_v62 = vadd.f32 %v1074_v61, %v995_v18  ;;  %v486_v63 = vpop.f32.mrb[13].mxu0 }
 0x190   : > { %v487_v0 = vadd.f32 %v995_v18, %v486_v63  ;;  %v1075_v1 = vpop.f32.mrb[14].mxu0  ;;  %1100 = vmatprep.mubr.bf16.mxu1 %v521_v60 }
 0x191   : > { %v515_v2 = vmax.f32 %v495_v62, 0.0  ;;  %v498_v3 = vadd.f32 %v1075_v1, %v995_v18  ;;  %v489_v4 = vpop.f32.mrb[15].mxu0  ;;  %1101 = vmatmul.mubr.bf16.gmra.mrb[4].mxu1 %v522_v59 }
 0x192   : > { %v490_v5 = vadd.f32 %v995_v18, %v489_v4  ;;  %v513_v7 = vmax.f32 %v487_v0, 0.0 }
 0x193   : > { %v516_v6 = vmax.f32 %v498_v3, 0.0 }
 0x194   : > { %v514_v8 = vmax.f32 %v490_v5, 0.0 }
 0x195   : > { %v524_v9 = vpack.c.bf16 %v516_v6, %v515_v2 }
 0x196   : > { %v523_v10 = vpack.c.bf16 %v514_v8, %v513_v7 }
 0x198   : > { %1104 = vmatprep.mubr.bf16.mxu1 %v523_v10 }
 0x199   : > { %1105 = vmatmul.mubr.bf16.gmra.mrb[8].mxu1 %v524_v9 }
 0x254   : > { %v1094_v12 = vpop.f32.mrb[16].mxu0 }
 0x255   : > { %v639_v13 = vadd.f32 %v1094_v12, %v1014_v11  ;;  %v630_v14 = vpop.f32.mrb[17].mxu0 }
 0x256   : > { %v631_v15 = vadd.f32 %v1014_v11, %v630_v14  ;;  %v1095_v16 = vpop.f32.mrb[18].mxu0 }
 0x257   : > { %697 = vmax.xlane.f32.xlu1 %v639_v13  ;;  %v633_v17 = vpop.f32.mrb[19].mxu0  ;;  %v642_v19 = vadd.f32 %v1095_v16, %v1014_v11 }
 0x258   : > { %693 = vmax.xlane.f32.xlu0 %v631_v15  ;;  %v634_v20 = vadd.f32 %v1014_v11, %v633_v17 }
 0x25b   : > { %699 = vmax.xlane.f32.xlu1 %v642_v19 }
 0x25c   : > { %v1098_v18 = vpop.f32.mrb[0].mxu1  ;;  %695 = vmax.xlane.f32.xlu0 %v634_v20 }
 0x25d   : > { %v655_v21 = vadd.f32 %v1098_v18, %v1014_v11  ;;  %v646_v22 = vpop.f32.mrb[1].mxu1 }
 0x25e   : > { %v1099_v23 = vpop.f32.mrb[2].mxu1  ;;  %v647_v26 = vadd.f32 %v1014_v11, %v646_v22 }
 0x25f   : > { %v658_v24 = vadd.f32 %v1099_v23, %v1014_v11  ;;  %v649_v25 = vpop.f32.mrb[3].mxu1 }
 0x260   : > { %705 = vmax.xlane.f32.xlu0 %v655_v21  ;;  %v650_v27 = vadd.f32 %v1014_v11, %v649_v25 }
 0x261   : > { %707 = vmax.xlane.f32.xlu1 %v658_v24 }
 0x264   : > { %v1102_v28 = vpop.f32.mrb[4].mxu1  ;;  %701 = vmax.xlane.f32.xlu0 %v647_v26 }
 0x265   : > { %v1809_v29 = vadd.f32 %v1102_v28, %v1014_v11  ;;  %v662_v30 = vpop.f32.mrb[5].mxu1  ;;  %703 = vmax.xlane.f32.xlu1 %v650_v27 }
 0x266   : > { %v1103_v31 = vpop.f32.mrb[6].mxu1  ;;  %v1815_v34 = vadd.f32 %v1014_v11, %v662_v30 }
 0x267   : > { %v1811_v32 = vadd.f32 %v1103_v31, %v1014_v11  ;;  %v665_v33 = vpop.f32.mrb[7].mxu1 }
 0x268   : > { %713 = vmax.xlane.f32.xlu0 %v1809_v29  ;;  %v1817_v35 = vadd.f32 %v1014_v11, %v665_v33 }
 0x269   : > { %715 = vmax.xlane.f32.xlu1 %v1811_v32 }
 0x26c   : > { %v1106_v36 = vpop.f32.mrb[8].mxu1  ;;  %709 = vmax.xlane.f32.xlu0 %v1815_v34 }
 0x26d   : > { %v678_v37 = vpop.f32.mrb[9].mxu1  ;;  %711 = vmax.xlane.f32.xlu1 %v1817_v35  ;;  %v1826_v42 = vadd.f32 %v1106_v36, %v1014_v11 }
 0x26e   : > { %v1821_v38 = vadd.f32 %v1014_v11, %v678_v37  ;;  %v1107_v39 = vpop.f32.mrb[10].mxu1 }
 0x26f   : > { %v681_v40 = vpop.f32.mrb[11].mxu1  ;;  %v1829_v43 = vadd.f32 %v1107_v39, %v1014_v11 }
 0x270   : > { %v1823_v41 = vadd.f32 %v1014_v11, %v681_v40  ;;  %717 = vmax.xlane.f32.xlu0 %v1821_v38 }
 0x272   : > { %719 = vmax.xlane.f32.xlu1 %v1823_v41 }
 0x274   : > { %721 = vmax.xlane.f32.xlu0 %v1826_v42 }
 0x276   : > { %723 = vmax.xlane.f32.xlu1 %v1829_v43 }
 0x2e4   : > { %v698_v44 = vpop.xlane.xlu1 %697 }
 0x2e5   : > { %v727_v45 = vsub.f32 %v639_v13, %v698_v44  ;;  %v694_v46 = vpop.xlane.xlu0 %693 }
 0x2e6   : > { %v725_v47 = vsub.f32 %v631_v15, %v694_v46 }
 0x2e7   : > { %v745_v48 = vmul.f32 1.442695, %v727_v45 }
 0x2e8   : > { %v741_v49 = vmul.f32 1.442695, %v725_v47  ;;  %v700_v50 = vpop.xlane.xlu1 %699 }
 0x2e9   : > { %1233 = vpow2.f32 %v745_v48  ;;  %v728_v51 = vsub.f32 %v642_v19, %v700_v50  ;;  %v696_v52 = vpop.xlane.xlu0 %695 }
 0x2ea   : > { %v726_v53 = vsub.f32 %v634_v20, %v696_v52  ;;  %1235 = vpow2.f32 %v741_v49 }
 0x2eb   : > { %v747_v54 = vmul.f32 1.442695, %v728_v51 }
 0x2ec   : > { %v743_v55 = vmul.f32 1.442695, %v726_v53 }
 0x2ed   : > { %1237 = vpow2.f32 %v747_v54  ;;  %v706_v56 = vpop.xlane.xlu0 %705 }
 0x2ee   : > { %v731_v57 = vsub.f32 %v655_v21, %v706_v56  ;;  %v708_v58 = vpop.xlane.xlu1 %707  ;;  %1239 = vpow2.f32 %v743_v55 }
 0x2ef   : > { %v732_v59 = vsub.f32 %v658_v24, %v708_v58 }
 0x2f0   : > { %v753_v60 = vmul.f32 1.442695, %v731_v57 }
 0x2f1   : > { %v755_v61 = vmul.f32 1.442695, %v732_v59  ;;  %v702_v62 = vpop.xlane.xlu0 %701 }
 0x2f2   : > { %1241 = vpow2.f32 %v753_v60  ;;  %v729_v63 = vsub.f32 %v647_v26, %v702_v62  ;;  %v704_v0 = vpop.xlane.xlu1 %703 }
 0x2f3   : > { %v1833_v1 = vpop.eup %1233  ;;  %v730_v2 = vsub.f32 %v650_v27, %v704_v0  ;;  %1243 = vpow2.f32 %v755_v61 }
 0x2f4   : > { %v749_v3 = vmul.f32 1.442695, %v729_v63  ;;  %777 = vadd.xlane.f32.xlu0 %v1833_v1  ;;  %v1836_v6 = vpop.eup %1235 }
 0x2f5   : > { %v751_v4 = vmul.f32 1.442695, %v730_v2  ;;  %v714_v5 = vpop.xlane.xlu0 %713 }
 0x2f6   : > { %1245 = vpow2.f32 %v749_v3  ;;  %v735_v7 = vsub.f32 %v1809_v29, %v714_v5  ;;  %v716_v8 = vpop.xlane.xlu1 %715 }
 0x2f7   : > { %v1839_v9 = vpop.eup %1237  ;;  %v736_v10 = vsub.f32 %v1811_v32, %v716_v8  ;;  %1247 = vpow2.f32 %v751_v4 }
 0x2f8   : > { %v761_v11 = vmul.f32 1.442695, %v735_v7  ;;  %779 = vadd.xlane.f32.xlu1 %v1839_v9  ;;  %773 = vadd.xlane.f32.xlu0 %v1836_v6  ;;  %v1845_v16 = vpop.eup %1239 }
 0x2f9   : > { %v763_v12 = vmul.f32 1.442695, %v736_v10  ;;  %v710_v13 = vpop.xlane.xlu0 %709 }
 0x2fa   : > { %1249 = vpow2.f32 %v761_v11  ;;  %v733_v14 = vsub.f32 %v1815_v34, %v710_v13  ;;  %v712_v15 = vpop.xlane.xlu1 %711 }
 0x2fb   : > { %v734_v17 = vsub.f32 %v1817_v35, %v712_v15  ;;  %1251 = vpow2.f32 %v763_v12 }
 0x2fc   : > { %v1848_v19 = vpop.eup %1241  ;;  %v757_v20 = vmul.f32 1.442695, %v733_v14  ;;  %775 = vadd.xlane.f32.xlu1 %v1845_v16 }
 0x2fd   : > { %v759_v18 = vmul.f32 1.442695, %v734_v17  ;;  %785 = vadd.xlane.f32.xlu0 %v1848_v19  ;;  %v718_v21 = vpop.xlane.xlu0 %717  ;;  %v1853_v23 = vpop.eup %1243 }
 0x2fe   : > { %1253 = vpow2.f32 %v757_v20  ;;  %v737_v22 = vsub.f32 %v1821_v38, %v718_v21 }
 0x2ff   : > { %v720_v24 = vpop.xlane.xlu1 %719  ;;  %1255 = vpow2.f32 %v759_v18 }
 0x300   : > { %v1855_v25 = vpop.eup %1245  ;;  %v765_v26 = vmul.f32 1.442695, %v737_v22  ;;  %v738_v27 = vsub.f32 %v1823_v41, %v720_v24  ;;  %787 = vadd.xlane.f32.xlu1 %v1853_v23 }
 0x301   : > { %781 = vadd.xlane.f32.xlu0 %v1855_v25  ;;  %v722_v28 = vpop.xlane.xlu0 %721  ;;  %v1861_v31 = vpop.eup %1247 }
 0x302   : > { %1257 = vpow2.f32 %v765_v26  ;;  %v767_v29 = vmul.f32 1.442695, %v738_v27  ;;  %v739_v30 = vsub.f32 %v1826_v42, %v722_v28 }
 0x303   : > { %v724_v32 = vpop.xlane.xlu1 %723 }
 0x304   : > { %v1863_v33 = vpop.eup %1249  ;;  %1259 = vpow2.f32 %v767_v29  ;;  %v769_v34 = vmul.f32 1.442695, %v739_v30  ;;  %v740_v35 = vsub.f32 %v1829_v43, %v724_v32  ;;  %783 = vadd.xlane.f32.xlu1 %v1861_v31 }
 0x305   : > { %793 = vadd.xlane.f32.xlu0 %v1863_v33  ;;  %v1868_v37 = vpop.eup %1251 }
 0x306   : > { %1261 = vpow2.f32 %v769_v34  ;;  %v771_v36 = vmul.f32 1.442695, %v740_v35 }
 0x308   : > { %v1870_v38 = vpop.eup %1253  ;;  %1263 = vpow2.f32 %v771_v36  ;;  %795 = vadd.xlane.f32.xlu1 %v1868_v37 }
 0x309   : > { %789 = vadd.xlane.f32.xlu0 %v1870_v38  ;;  %v1874_v39 = vpop.eup %1255 }
 0x30c   : > { %v1876_v40 = vpop.eup %1257  ;;  %791 = vadd.xlane.f32.xlu1 %v1874_v39 }
 0x30d   : > { %797 = vadd.xlane.f32.xlu0 %v1876_v40 }
 0x30e   : > { %v1880_v41 = vpop.eup %1259 }
 0x310   : > { %v1882_v42 = vpop.eup %1261  ;;  %799 = vadd.xlane.f32.xlu1 %v1880_v41 }
 0x311   : > { %801 = vadd.xlane.f32.xlu0 %v1882_v42 }
 0x312   : > { %v1886_v43 = vpop.eup %1263 }
 0x314   : > { %803 = vadd.xlane.f32.xlu1 %v1886_v43 }
 0x381   : > { %v778_v44 = vpop.xlane.xlu0 %777 }
 0x382   : > { %1265 = vrcp.f32 %v778_v44 }
 0x385   : > { %v780_v45 = vpop.xlane.xlu1 %779  ;;  %v774_v46 = vpop.xlane.xlu0 %773 }
 0x386   : > { %1267 = vrcp.f32 %v780_v45 }
 0x387   : > { %1269 = vrcp.f32 %v774_v46 }
 0x389   : > { %v776_v47 = vpop.xlane.xlu1 %775 }
 0x38a   : > { %1271 = vrcp.f32 %v776_v47  ;;  %v786_v48 = vpop.xlane.xlu0 %785 }
 0x38b   : > { %1273 = vrcp.f32 %v786_v48 }
 0x38c   : > { %v1266_v49 = vpop.eup %1265 }
 0x38d   : > { %v823_v50 = vmul.f32 %v1266_v49, %v1833_v1  ;;  %v788_v51 = vpop.xlane.xlu1 %787 }
 0x38e   : > { %1275 = vrcp.f32 %v788_v51  ;;  %v782_v52 = vpop.xlane.xlu0 %781 }
 0x38f   : > { %839 = vst [vmem:[%s1891_s26 + $0x10] sm:$0xff] %v823_v50  ;;  %1277 = vrcp.f32 %v782_v52 }
 0x390   : > { %v1268_v53 = vpop.eup %1267 }
 0x391   : > { %v1270_v54 = vpop.eup %1269  ;;  %v824_v55 = vmul.f32 %v1268_v53, %v1839_v9  ;;  %v784_v56 = vpop.xlane.xlu1 %783 }
 0x392   : > { %v821_v57 = vmul.f32 %v1270_v54, %v1836_v6  ;;  %1279 = vrcp.f32 %v784_v56  ;;  %v794_v58 = vpop.xlane.xlu0 %793 }
 0x393   : > { %840 = vst [vmem:[%s1891_s26 + $0x18] sm:$0xff] %v824_v55  ;;  %1281 = vrcp.f32 %v794_v58 }
 0x394   : > { %v1272_v59 = vpop.eup %1271  ;;  %837 = vst [vmem:[%s1891_s26] sm:$0xff] %v821_v57 }
 0x395   : > { %v1274_v60 = vpop.eup %1273  ;;  %v822_v61 = vmul.f32 %v1272_v59, %v1845_v16  ;;  %v796_v62 = vpop.xlane.xlu1 %795 }
 0x396   : > { %v827_v63 = vmul.f32 %v1274_v60, %v1848_v19  ;;  %1283 = vrcp.f32 %v796_v62  ;;  %v790_v0 = vpop.xlane.xlu0 %789 }
 0x397   : > { %838 = vst [vmem:[%s1891_s26 + $0x8] sm:$0xff] %v822_v61  ;;  %1285 = vrcp.f32 %v790_v0 }
 0x398   : > { %v1276_v1 = vpop.eup %1275  ;;  %843 = vst [vmem:[%s1891_s26 + $0x30] sm:$0xff] %v827_v63 }
 0x399   : > { %v1278_v2 = vpop.eup %1277  ;;  %v828_v3 = vmul.f32 %v1276_v1, %v1853_v23  ;;  %v792_v4 = vpop.xlane.xlu1 %791 }
 0x39a   : > { %v825_v5 = vmul.f32 %v1278_v2, %v1855_v25  ;;  %1287 = vrcp.f32 %v792_v4  ;;  %v798_v6 = vpop.xlane.xlu0 %797 }
 0x39b   : > { %844 = vst [vmem:[%s1891_s26 + $0x38] sm:$0xff] %v828_v3  ;;  %1289 = vrcp.f32 %v798_v6 }
 0x39c   : > { %v1280_v7 = vpop.eup %1279  ;;  %841 = vst [vmem:[%s1891_s26 + $0x20] sm:$0xff] %v825_v5 }
 0x39d   : > { %v1282_v8 = vpop.eup %1281  ;;  %v826_v9 = vmul.f32 %v1280_v7, %v1861_v31  ;;  %v800_v10 = vpop.xlane.xlu1 %799 }
 0x39e   : > { %v831_v11 = vmul.f32 %v1282_v8, %v1863_v33  ;;  %1291 = vrcp.f32 %v800_v10  ;;  %v802_v12 = vpop.xlane.xlu0 %801 }
 0x39f   : > { %842 = vst [vmem:[%s1891_s26 + $0x28] sm:$0xff] %v826_v9  ;;  %1293 = vrcp.f32 %v802_v12 }
 0x3a0   : > { %v1284_v13 = vpop.eup %1283  ;;  %847 = vst [vmem:[%s1891_s26 + $0x50] sm:$0xff] %v831_v11 }
 0x3a1   : > { %v1286_v14 = vpop.eup %1285  ;;  %v832_v15 = vmul.f32 %v1284_v13, %v1868_v37  ;;  %v804_v16 = vpop.xlane.xlu1 %803 }
 0x3a2   : > { %v829_v17 = vmul.f32 %v1286_v14, %v1870_v38  ;;  %1295 = vrcp.f32 %v804_v16 }
 0x3a3   : > { %848 = vst [vmem:[%s1891_s26 + $0x58] sm:$0xff] %v832_v15 }
 0x3a4   : > { %v1288_v19 = vpop.eup %1287  ;;  %845 = vst [vmem:[%s1891_s26 + $0x40] sm:$0xff] %v829_v17 }
 0x3a5   : > { %v1290_v20 = vpop.eup %1289  ;;  %v830_v18 = vmul.f32 %v1288_v19, %v1874_v39 }
 0x3a6   : > { %v833_v21 = vmul.f32 %v1290_v20, %v1876_v40 }
 0x3a7   : > { %846 = vst [vmem:[%s1891_s26 + $0x48] sm:$0xff] %v830_v18 }
 0x3a8   : > { %v1292_v22 = vpop.eup %1291  ;;  %849 = vst [vmem:[%s1891_s26 + $0x60] sm:$0xff] %v833_v21 }
 0x3a9   : > { %v1294_v23 = vpop.eup %1293  ;;  %v834_v24 = vmul.f32 %v1292_v22, %v1880_v41 }
 0x3aa   : > { %v835_v25 = vmul.f32 %v1294_v23, %v1882_v42 }
 0x3ab   : > { %850 = vst [vmem:[%s1891_s26 + $0x68] sm:$0xff] %v834_v24 }
 0x3ac   : > { %v1296_v26 = vpop.eup %1295  ;;  %851 = vst [vmem:[%s1891_s26 + $0x70] sm:$0xff] %v835_v25 }
 0x3ad   : > { %v836_v27 = vmul.f32 %v1296_v26, %v1886_v43 }
 0x3af   : > { %852 = vst [vmem:[%s1891_s26 + $0x78] sm:$0xff] %v836_v27 }
 0x3b0   : > { %1452 = shalt.err (!%p1449_p13)
}
 0x3b1   : > { %s1453_s12 = scalar_lea.hbm %s1927_s28, 2048  ;;  %s1457_s15 = scalar_lea.hbm %s1980_s5, 4096 }
 0x3b2   : > { %p1454_p9 = scmp.ne.s32.totalorder %s1927_s28, %s1453_s12  ;;  %p1458_p6 = scmp.lt.u32.totalorder %s1927_s28, %s1980_s5 }
 0x3b3   : > { %p1459_p4 = scmp.lt.u32.totalorder %s1457_s15, %s1453_s12  ;;  %p1461_p3 = scmp.lt.u32.totalorder %s1453_s12, %s1927_s28 }
 0x3b4   : > { %p1455_p0 = pnand %p1454_p9, %p1720_p10 }
 0x3b5   : > { %p1460_p8 = por %p1459_p4, %p1458_p6 }
 0x3b6   : > { %p1456_p11 = pneg %p1455_p0 }
 0x3b7   : > { %p1462_p5 = por %p1461_p3, %p1460_p8 }
 0x3b9   : > { %p1463_p7 = pnand %p1462_p5, %p1456_p11 }
 0x3bb   : > { %1466 = shalt.err (!%p1463_p7)
}
 0x3bc   : > { %s1523_s23 = smov 128   ;;  %s1524_s16 = smov 8  }
 0x3bd   : > { %1142 = dma.vmem_to_hbm [thread:$0]  (%p1720_p10), %s1929_s27, 2048, %s1927_s28, %s854_s22, %s1523_s23, %s1523_s23, %s1524_s16  }
 0x3be PF: > { %s882_s6 = sand.u32 1, %s1501_s18   ;;  %p1998_p12 = scmp.ne.s32.totalorder %s1985_s25, 0 }
 0x3bf   : > { %p1999_p1 = scmp.ge.s32.totalorder %s1513_s21, 2  ;;  %s883_s17 = scalar_lea.sflag [#allocation4], %s882_s6 }
 0x3c1   : > { %p1162_p2 = pnand %p1999_p1, %p1998_p12 }
 0x3c3   : > { %1496 = dma.done.wait (!%p1162_p2), %s883_s17, 2048  }
 0x3c4   : > { %1498 = vsyncadd (!%p1162_p2), %s883_s17, 4294965248  ;;  %p20_p13 = scmp.ge.s32.totalorder %s1710_s14, 4   ;;  %s2000_s18 = smov %s1505_s19 }
 0x3c5   : > { %s2001_s19 = smov %s1509_s20  ;;  %s2002_s20 = smov %s1726_s10 }
 0x3c6   : > { %s2003_s21 = smov %s1710_s14  ;;  %22 = sbr.rel (!%p20_p13) target bundleno = 7 (0x7), region = 101 }
 0x3cd   :  { %888 = vsyncpa [#allocation3], 1 }
 0x3ce   :  { %890 = vsyncpa [#allocation3 + $0x1], 1 }
 0x3cf   :  { %891 = vsyncpa [#allocation6], 1 }
 0x3d0   :  { %892 = vsyncpa [#allocation9], 1 }
 0x3d1   :  { %893 = vsyncpa [#allocation4], 1 }
 0x3d2   :  { %895 = vsyncpa [#allocation4 + $0x1], 1 }

</bundles_post_ra>
